<compile_context>
chip_gen: v7x
topology: tpu7x:2x2x1
jax: 0.10.0
libtpu: 0.0.40
codegen_flags: <defaults>
</compile_context>

<pallas_src>
import jax
import jax.numpy as jnp
from jax.experimental import pallas as pl
from jax.experimental.pallas import tpu as pltpu


def _round_up(a, m):
    return ((a + m - 1) // m) * m


def _cdiv(a, b):
    return (a + b - 1) // b


def policy_kernel(x_ref, w1_ref, w2_ref, w3_ref, bh_ref, b3_ref, o_ref):
    """One batch tile of the fused 3-layer MLP.

    x_ref : (TM, IN)    f32   (cast to bf16 in-kernel; cast is VPU filler)
    w1_ref: (IN, H)     bf16
    w2_ref: (H, H)      bf16
    w3_ref: (H, OUT)    bf16
    bh_ref: (2, H)      f32   row0 = b1, row1 = b2
    b3_ref: (1, OUT)    f32
    o_ref : (TM, OUT)   f32
    """
    x = x_ref[...].astype(jnp.bfloat16)
    b1 = bh_ref[0:1, :]
    b2 = bh_ref[1:2, :]
    b3 = b3_ref[...]

    # fc1 + relu (MXU bf16, f32 accumulate; relu in f32)
    h1 = jnp.dot(x, w1_ref[...], preferred_element_type=jnp.float32) + b1
    h1 = jnp.maximum(h1, 0.0).astype(jnp.bfloat16)

    # fc2 + relu
    h2 = jnp.dot(h1, w2_ref[...], preferred_element_type=jnp.float32) + b2
    h2 = jnp.maximum(h2, 0.0).astype(jnp.bfloat16)

    # output + sigmoid (exp on EUP, approx reciprocal on EUP)
    logits = jnp.dot(h2, w3_ref[...], preferred_element_type=jnp.float32) + b3
    o_ref[...] = pl.reciprocal(1.0 + jnp.exp(-logits), approx=True)


def init_policy_params(key, input_shape, action_space, hidden=32):
    """Deterministic init mirroring nn.Linear's U(-1/sqrt(fan_in), 1/sqrt(fan_in)).

    Weights stored as (in_features, out_features); biases as (1, out). f32."""
    def linear_init(k, fan_in, fan_out):
        kw, kb = jax.random.split(k)
        bound = 1.0 / jnp.sqrt(float(fan_in))
        w = jax.random.uniform(kw, (fan_in, fan_out), jnp.float32, -bound, bound)
        b = jax.random.uniform(kb, (1, fan_out), jnp.float32, -bound, bound)
        return w, b

    k1, k2, k3 = jax.random.split(key, 3)
    w1, b1 = linear_init(k1, input_shape, hidden)
    w2, b2 = linear_init(k2, hidden, hidden)
    w3, b3 = linear_init(k3, hidden, action_space)
    return (w1, b1, w2, b2, w3, b3)


def prepare_params(params):
    """Cast weights to bf16; pack the two hidden biases into one (2, H) array."""
    w1, b1, w2, b2, w3, b3 = params
    b_hid = jnp.concatenate([b1, b2], axis=0)          # (2, H) f32
    return (w1.astype(jnp.bfloat16),
            w2.astype(jnp.bfloat16),
            w3.astype(jnp.bfloat16),
            b_hid,
            b3)                                         # (1, OUT) f32


def _choose_tiling(batch, tm_max=2048, min_split_rows=512):
    """Pick (tm, steps): balanced tiles for ragged batches; even step count for
    large batches so both TensorCores are used on v7x."""
    steps = max(1, _cdiv(batch, tm_max))
    if steps % 2 == 1 and batch >= min_split_rows:
        steps += 1
    tm = _round_up(_cdiv(batch, steps), 8)
    return tm, steps


def policy_forward(x, prepared, tm_max=2048):
    """Batched forward. Grid tiles the batch; weights stay VMEM-resident."""
    w1, w2, w3, b_hid, b3 = prepared
    batch, in_f = x.shape
    hidden = w1.shape[1]
    act = w3.shape[1]

    tm, steps = _choose_tiling(batch, tm_max)
    b_pad = tm * steps
    if b_pad != batch:
        x = jnp.pad(x, ((0, b_pad - batch), (0, 0)))    # only for ragged batches

    out = pl.pallas_call(
        policy_kernel,
        out_shape=jax.ShapeDtypeStruct((b_pad, act), jnp.float32),
        grid=(steps,),
        in_specs=[
            pl.BlockSpec((tm, in_f), lambda i: (i, 0)),       # x tile (pipelined, f32)
            pl.BlockSpec((in_f, hidden), lambda i: (0, 0)),   # w1 (resident)
            pl.BlockSpec((hidden, hidden), lambda i: (0, 0)), # w2 (resident)
            pl.BlockSpec((hidden, act), lambda i: (0, 0)),    # w3 (resident)
            pl.BlockSpec((2, hidden), lambda i: (0, 0)),      # b1/b2 packed
            pl.BlockSpec((1, act), lambda i: (0, 0)),         # b3
        ],
        out_specs=pl.BlockSpec((tm, act), lambda i: (i, 0)),  # unpadded writeback
        compiler_params=pltpu.CompilerParams(
            dimension_semantics=("parallel",),                # shards over 2 TCs on v7x
            vmem_limit_bytes=32 * 1024 * 1024),
    )(x, w1, w2, w3, b_hid, b3)

    return out if b_pad == batch else out[:batch]


def ref_forward_bf16(x, params):
    """Pure-JAX reference mirroring the kernel's bf16-matmul / f32-accumulate path
    (exact sigmoid; kernel uses EUP approx reciprocal -> compare at 5e-3)."""
    # TODO(synk): for strict parity with the f32 PyTorch module keep matmuls in
    # f32; at these sizes the kernel is HBM-bound so bf16 is a free MXU choice.
    w1, b1, w2, b2, w3, b3 = params
    xb = x.astype(jnp.bfloat16)
    w1b, w2b, w3b = (w.astype(jnp.bfloat16) for w in (w1, w2, w3))
    h1 = jnp.maximum(jnp.dot(xb, w1b, preferred_element_type=jnp.float32) + b1, 0.0)
    h1 = h1.astype(jnp.bfloat16)
    h2 = jnp.maximum(jnp.dot(h1, w2b, preferred_element_type=jnp.float32) + b2, 0.0)
    h2 = h2.astype(jnp.bfloat16)
    logits = jnp.dot(h2, w3b, preferred_element_type=jnp.float32) + b3
    return jax.nn.sigmoid(logits)


if __name__ == "__main__":
    # Shapes consistent with the module: input_shape=16, hidden=32, actions=4
    input_shape, action_space = 16, 4

    key = jax.random.PRNGKey(0)
    key_params, kx1, kx2, kx3 = jax.random.split(key, 4)

    params = init_policy_params(key_params, input_shape, action_space)
    prepared = prepare_params(params)

    cases = [
        ("small", 8, kx1),      # single tiny grid step
        ("large", 1024, kx2),   # even split -> 2 grid steps of 512 (both TCs on v7x)
        ("ragged", 1037, kx3),  # balanced tiles + row padding path
    ]
    for name, bs, kx in cases:
        x = jax.random.normal(kx, (bs, input_shape), dtype=jnp.float32)
        out = jax.block_until_ready(policy_forward(x, prepared))
        assert out.shape == (bs, action_space), name
        assert bool(jnp.all((out > 0.0) & (out < 1.0))), name
        ref = ref_forward_bf16(x, params)
        # 5e-3 tolerance: bf16 matmul path is replicated by the reference; the
        # residual difference is only the EUP approx-reciprocal sigmoid.
        assert bool(jnp.allclose(out, ref, atol=5e-3, rtol=5e-3)), name

    print("KERNEL_OK")
</pallas_src>

<mosaic_0001>
module attributes {stable_mosaic.version = 11 : i64} {
  func.func @policy_kernel(%arg0: i32, %arg1: memref<8x16xf32, #tpu.memory_space<vmem>>, %arg2: memref<16x32xbf16, #tpu.memory_space<vmem>>, %arg3: memref<32x32xbf16, #tpu.memory_space<vmem>>, %arg4: memref<32x4xbf16, #tpu.memory_space<vmem>>, %arg5: memref<2x32xf32, #tpu.memory_space<vmem>>, %arg6: memref<1x4xf32, #tpu.memory_space<vmem>>, %arg7: memref<8x4xf32, #tpu.memory_space<vmem>>) attributes {dimension_semantics = [#tpu.dimension_semantics<parallel>], iteration_bounds = array<i64: 1>, scalar_prefetch = 0 : i64, scratch_operands = 0 : i64, tpu.core_type = #tpu.core_type<tc>, window_params = [{transform_indices = @transform_0, window_bounds = array<i64: 8, 16>}, {pipeline_mode = #tpu.pipeline_mode<synchronous>, transform_indices = @transform_1, window_bounds = array<i64: 16, 32>}, {pipeline_mode = #tpu.pipeline_mode<synchronous>, transform_indices = @transform_2, window_bounds = array<i64: 32, 32>}, {pipeline_mode = #tpu.pipeline_mode<synchronous>, transform_indices = @transform_3, window_bounds = array<i64: 32, 4>}, {pipeline_mode = #tpu.pipeline_mode<synchronous>, transform_indices = @transform_4, window_bounds = array<i64: 2, 32>}, {pipeline_mode = #tpu.pipeline_mode<synchronous>, transform_indices = @transform_5, window_bounds = array<i64: 1, 4>}, {transform_indices = @transform_6, window_bounds = array<i64: 8, 4>}]} {
    %c0 = arith.constant 0 : index
    %c0_0 = arith.constant 0 : index
    %0 = vector.load %arg1[%c0, %c0_0] : memref<8x16xf32, #tpu.memory_space<vmem>>, vector<8x16xf32>
    %1 = arith.truncf %0 : vector<8x16xf32> to vector<8x16xbf16>
    %c0_1 = arith.constant 0 : index
    %c0_2 = arith.constant 0 : index
    %2 = vector.load %arg5[%c0_1, %c0_2] : memref<2x32xf32, #tpu.memory_space<vmem>>, vector<1x32xf32>
    %c1 = arith.constant 1 : index
    %c0_3 = arith.constant 0 : index
    %3 = vector.load %arg5[%c1, %c0_3] : memref<2x32xf32, #tpu.memory_space<vmem>>, vector<1x32xf32>
    %c0_4 = arith.constant 0 : index
    %c0_5 = arith.constant 0 : index
    %4 = vector.load %arg6[%c0_4, %c0_5] : memref<1x4xf32, #tpu.memory_space<vmem>>, vector<1x4xf32>
    %c0_6 = arith.constant 0 : index
    %c0_7 = arith.constant 0 : index
    %5 = vector.load %arg2[%c0_6, %c0_7] : memref<16x32xbf16, #tpu.memory_space<vmem>>, vector<16x32xbf16>
    %cst = arith.constant dense<0.000000e+00> : vector<8x32xf32>
    %6 = tpu.matmul %1, %5, %cst {dimension_numbers = #tpu.dot_dimension_numbers<[1], [0], [0], [1], [0, 0, 1, 1], [], []>} : vector<8x16xbf16>, vector<16x32xbf16>, vector<8x32xf32> -> vector<8x32xf32>
    %7 = vector.broadcast %2 : vector<1x32xf32> to vector<8x32xf32>
    %8 = arith.addf %6, %7 : vector<8x32xf32>
    %cst_8 = arith.constant 0.000000e+00 : f32
    %9 = vector.broadcast %cst_8 : f32 to vector<8x32xf32>
    %10 = arith.maximumf %8, %9 : vector<8x32xf32>
    %11 = arith.truncf %10 : vector<8x32xf32> to vector<8x32xbf16>
    %c0_9 = arith.constant 0 : index
    %c0_10 = arith.constant 0 : index
    %12 = vector.load %arg3[%c0_9, %c0_10] : memref<32x32xbf16, #tpu.memory_space<vmem>>, vector<32x32xbf16>
    %cst_11 = arith.constant dense<0.000000e+00> : vector<8x32xf32>
    %13 = tpu.matmul %11, %12, %cst_11 {dimension_numbers = #tpu.dot_dimension_numbers<[1], [0], [0], [1], [0, 0, 1, 1], [], []>} : vector<8x32xbf16>, vector<32x32xbf16>, vector<8x32xf32> -> vector<8x32xf32>
    %14 = vector.broadcast %3 : vector<1x32xf32> to vector<8x32xf32>
    %15 = arith.addf %13, %14 : vector<8x32xf32>
    %cst_12 = arith.constant 0.000000e+00 : f32
    %16 = vector.broadcast %cst_12 : f32 to vector<8x32xf32>
    %17 = arith.maximumf %15, %16 : vector<8x32xf32>
    %18 = arith.truncf %17 : vector<8x32xf32> to vector<8x32xbf16>
    %c0_13 = arith.constant 0 : index
    %c0_14 = arith.constant 0 : index
    %19 = vector.load %arg4[%c0_13, %c0_14] : memref<32x4xbf16, #tpu.memory_space<vmem>>, vector<32x4xbf16>
    %cst_15 = arith.constant dense<0.000000e+00> : vector<8x4xf32>
    %20 = tpu.matmul %18, %19, %cst_15 {dimension_numbers = #tpu.dot_dimension_numbers<[1], [0], [0], [1], [0, 0, 1, 1], [], []>} : vector<8x32xbf16>, vector<32x4xbf16>, vector<8x4xf32> -> vector<8x4xf32>
    %21 = vector.broadcast %4 : vector<1x4xf32> to vector<8x4xf32>
    %22 = arith.addf %20, %21 : vector<8x4xf32>
    %cst_16 = arith.constant 0.000000e+00 : f32
    %23 = vector.broadcast %cst_16 : f32 to vector<8x4xf32>
    %24 = arith.subf %23, %22 : vector<8x4xf32>
    %25 = math.exp %24 : vector<8x4xf32>
    %cst_17 = arith.constant 1.000000e+00 : f32
    %26 = vector.broadcast %cst_17 : f32 to vector<8x4xf32>
    %27 = arith.addf %26, %25 : vector<8x4xf32>
    %28 = tpu.reciprocal %27 {approx = true} : vector<8x4xf32> -> vector<8x4xf32>
    %c0_18 = arith.constant 0 : index
    %c0_19 = arith.constant 0 : index
    %29 = vector.load %arg7[%c0_18, %c0_19] : memref<8x4xf32, #tpu.memory_space<vmem>>, vector<8x4xf32>
    tpu.vector_store %arg7[%c0_18, %c0_19], %28 {strides = array<i32>} : memref<8x4xf32, #tpu.memory_space<vmem>>, vector<8x4xf32>,
    return
  }
  func.func @transform_0(%arg0: i32) -> (i32, i32) {
    %c0_i32 = arith.constant 0 : i32
    %c0_i32_0 = arith.constant 0 : i32
    return %arg0, %c0_i32 : i32, i32
  }
  func.func @transform_1(%arg0: i32) -> (i32, i32) {
    %c0_i32 = arith.constant 0 : i32
    %c0_i32_0 = arith.constant 0 : i32
    %c0_i32_1 = arith.constant 0 : i32
    return %c0_i32, %c0_i32_0 : i32, i32
  }
  func.func @transform_2(%arg0: i32) -> (i32, i32) {
    %c0_i32 = arith.constant 0 : i32
    %c0_i32_0 = arith.constant 0 : i32
    %c0_i32_1 = arith.constant 0 : i32
    return %c0_i32, %c0_i32_0 : i32, i32
  }
  func.func @transform_3(%arg0: i32) -> (i32, i32) {
    %c0_i32 = arith.constant 0 : i32
    %c0_i32_0 = arith.constant 0 : i32
    %c0_i32_1 = arith.constant 0 : i32
    return %c0_i32, %c0_i32_0 : i32, i32
  }
  func.func @transform_4(%arg0: i32) -> (i32, i32) {
    %c0_i32 = arith.constant 0 : i32
    %c0_i32_0 = arith.constant 0 : i32
    %c0_i32_1 = arith.constant 0 : i32
    return %c0_i32, %c0_i32_0 : i32, i32
  }
  func.func @transform_5(%arg0: i32) -> (i32, i32) {
    %c0_i32 = arith.constant 0 : i32
    %c0_i32_0 = arith.constant 0 : i32
    %c0_i32_1 = arith.constant 0 : i32
    return %c0_i32, %c0_i32_0 : i32, i32
  }
  func.func @transform_6(%arg0: i32) -> (i32, i32) {
    %c0_i32 = arith.constant 0 : i32
    %c0_i32_0 = arith.constant 0 : i32
    return %arg0, %c0_i32 : i32, i32
  }
}

</mosaic_0001>

<bundles_post_ra>
// kernel: tpu_custom_call.1
= control target key start
LH: loop header
LB: loop body
LE: loop exit
PB: predicated region body
PF: predicated region fallthrough
CT: control target
= control target key end

     0   :  { %11 = vsyncpa [#allocation3], 0  ;;  %s323_s21 = smov [#allocation2]   ;;  %s402_s0 = inlined_call_operand.vmem [shape: f32[8,16], index: 0, kind: input, shape index: {}]   ;;  %s403_s1 = inlined_call_operand.hbm [shape: bf16[16,32], index: 1, kind: input, shape index: {}]   ;;  %s404_s2 = inlined_call_operand.vmem [shape: bf16[32,32], index: 2, kind: input, shape index: {}]   ;;  %s405_s3 = inlined_call_operand.vmem [shape: bf16[32,4], index: 3, kind: input, shape index: {}]   ;;  %s406_s4 = inlined_call_operand.vmem [shape: f32[2,32], index: 4, kind: input, shape index: {}]   ;;  %s407_s5 = inlined_call_operand.vmem [shape: f32[1,4], index: 5, kind: input, shape index: {}]   ;;  %s408_s6 = inlined_call_operand.vmem [shape: f32[8,4], index: 6, kind: output, shape index: {}]  }
   0x1   :  { %s19_s22 = sshll.u32 %s323_s21, 4  ;;  %s299_s25 = scalar_lea.hbm %s403_s1, 128  ;;  %s20_s22 = int_to_ptr.vmem [resolvable:$true] %s19_s22 }
   0x2   :  { %p300_p0 = scmp.ne.s32.totalorder %s403_s1, %s299_s25  ;;  %p303_p1 = scmp.lt.u32.totalorder %s299_s25, %s403_s1 }
   0x4   :  { %p305_p2 = pnand %p303_p1, %p300_p0 }
   0x6   :  { %308 = shalt.err (!%p305_p2)
}
   0x7   :  { %s309_s30 = scalar_lea.vmem %s20_s22, 128  ;;  %p314_p4 = scmp.lt.s32.totalorder %s20_s22, %s20_s22 }
   0x8   :  { %p310_p3 = scmp.ne.s32.totalorder %s20_s22, %s309_s30  ;;  %p315_p5 = scmp.lt.s32.totalorder %s309_s30, %s309_s30 }
   0xa   :  { %p316_p6 = por %p315_p5, %p314_p4 }
   0xc   :  { %p317_p7 = pnand %p316_p6, %p310_p3 }
   0xe   :  { %320 = shalt.err (!%p317_p7)
}
   0xf   :  { %s324_s7 = smov 64   ;;  %s325_s8 = smov 4  }
  0x10   :  { %25 = dma.hbm_to_vmem [thread:$0]  %s403_s1, 128, %s20_s22, [#allocation3], %s324_s7, %s324_s7, %s325_s8  }
  0x11   :  { %321 = dma.done.wait [#allocation3], 128  }
  0x12   :  { %322 = vsyncadd [#allocation3], 4294967168  ;;  %v326_v0 = vmov 0.0   ;;  %vm327_vm0 = vmmov 0   ;;  %v290_v1 = vld [vmem:[#allocation2] sm:$0xff]   ;;  %vm55_vm1 = vcmask 130048  }
  0x13   :  { %263 = vmatprep.subr.bf16.mxu0 %v326_v0  ;;  %265 = vmatprep.mubr.msk.bf16.mxu0 %vm327_vm0, %v326_v0  ;;  %v38_v2 = vld [vmem:[%s402_s0] sm:$0xff]  ;;  %v292_v5 = vld [vmem:[%s404_s2 + $0x8] sm:$0xff]   ;;  %vm121_vm2 = vcmask 261120   ;;  %vm237_vm3 = vcmask 31744  }
  0x14   :  { %269 = vmatprep.subr.bf16.mxu1 %v326_v0  ;;  %273 = vmatprep.mubr.msk.bf16.mxu1 %vm327_vm0, %v326_v0  ;;  %v39_v3 = vpack.c.bf16 %v38_v2, %v38_v2  ;;  %v291_v4 = vld [vmem:[%s404_s2] sm:$0xff]   ;;  %v294_v15 = vld [vmem:[%s405_s3 + $0x8] sm:$0xff]  }
  0x15   :  { %264 = vmatpush3.bf16.msra.mxu0 %v290_v1  ;;  %270 = vmatpush3.bf16.msra.mxu1 %v291_v4  ;;  %v293_v6 = vld [vmem:[%s405_s3] sm:$0xff]  }
  0x16   :  { %277 = vmatprep.subr.bf16.mxu0 %v326_v0  ;;  %271 = vmatprep.subr.bf16.mxu1 %v326_v0  ;;  %v244_v7 = vld [vmem:[%s406_s4] ss:$0 sm:$0xff]  ;;  %v247_v16 = vld [vmem:[%s406_s4 + $0x1] ss:$0 sm:$0xff] }
  0x17   :  { %v251_v24 = vld [vmem:[%s407_s5] ss:$0 sm:$0xff] }
  0x18   :  { %266 = vmatmul.mubr.msk.bf16.vlgmr.msra.gmra.mrb[0].mxu0 %vm55_vm1, %v39_v3 }
  0x19   :  { %281 = vmatprep.mubr.msk.bf16.mxu0 %vm327_vm0, %v326_v0  ;;  %272 = vmatpush3.bf16.msra.mxu1 %v292_v5 }
  0x1a   :  { %278 = vmatpush3.bf16.msra.mxu0 %v293_v6 }
  0x1b   :  { %279 = vmatprep.subr.bf16.mxu0 %v326_v0 }
  0x1e   :  { %280 = vmatpush3.bf16.msra.mxu0 %v294_v15 }
  0xeb   :  { %v93_v8 = vpop.f32.mrb[0].mxu0 }
  0xec   :  { %v94_v9 = vadd.f32 %v244_v7, %v93_v8  ;;  %v267_v10 = vpop.f32.mrb[1].mxu0 }
  0xed   :  { %v96_v11 = vpop.f32.mrb[2].mxu0 }
  0xee   :  { %v99_v12 = vmax.f32 %v94_v9, 0.0  ;;  %v268_v13 = vpop.f32.mrb[3].mxu0 }
  0xf0   :  { %v100_v14 = vpack.c.bf16 %v99_v12, %v99_v12 }
  0xf2   :  { %274 = vmatmul.mubr.msk.bf16.vlgmr.msra.gmra.mrb[0].mxu1 %vm121_vm2, %v100_v14 }
 0x1c5   :  { %v159_v17 = vpop.f32.mrb[0].mxu1 }
 0x1c6   :  { %v160_v18 = vadd.f32 %v247_v16, %v159_v17  ;;  %v275_v19 = vpop.f32.mrb[1].mxu1 }
 0x1c7   :  { %v162_v20 = vpop.f32.mrb[2].mxu1 }
 0x1c8   :  { %v165_v21 = vmax.f32 %v160_v18, 0.0  ;;  %v276_v22 = vpop.f32.mrb[3].mxu1 }
 0x1ca   :  { %v166_v23 = vpack.c.bf16 %v165_v21, %v165_v21 }
 0x1cc   :  { %282 = vmatmul.mubr.msk.bf16.vlgmr.msra.gmra.mrb[4].mxu0 %vm121_vm2, %v166_v23 }
 0x29f   :  { %v226_v25 = vpop.f32.mrb[4].mxu0 }
 0x2a0   :  { %v227_v26 = vadd.f32 %v251_v24, %v226_v25  ;;  %v283_v27 = vpop.f32.mrb[5].mxu0 }
 0x2a1   :  { %v229_v28 = vpop.f32.mrb[6].mxu0 }
 0x2a2   :  { %v232_v29 = vsub.f32 0.0, %v227_v26  ;;  %v284_v30 = vpop.f32.mrb[7].mxu0 }
 0x2a4   :  { %v233_v31 = vmul.f32 1.442695, %v232_v29 }
 0x2a6   :  { %295 = vpow2.f32 %v233_v31 }
 0x2b0   :  { %v296_v32 = vpop.eup %295 }
 0x2b1   :  { %v235_v33 = vadd.f32 1.0, %v296_v32 }
 0x2b3   :  { %297 = vrcp.f32 %v235_v33 }
 0x2bd   :  { %v298_v34 = vpop.eup %297 }
 0x2be   :  { %238 = vst.msk [vmem:[%s408_s6] sm:$0xff] %vm237_vm3, %v298_v34 }
 0x2bf   :  { %243 = vsyncpa [#allocation3], 1 }

</bundles_post_ra>
